<compile_context>
chip_gen: v6e
topology: v6e:2x2x1
jax: 0.10.0
libtpu: 0.0.40
codegen_flags: <defaults>
</compile_context>

<pallas_src>
import jax
import jax.numpy as jnp
from jax.experimental import pallas as pl
from jax.experimental.pallas import tpu as pltpu


def _round_up(x, m):
    return ((x + m - 1) // m) * m


def _cdiv(a, b):
    return (a + b - 1) // b


def _pick_block_m(M):
    """Token-block size: multiple of 8, capped at 512, >= 2 grid steps when possible."""
    if M <= 8:
        return 8
    bm = min(512, _round_up(M, 8))
    if _cdiv(M, bm) < 2:  # keep both v7x TensorCores busy
        bm = max(8, _round_up(_cdiv(M, 2), 8))
    return bm


# ---------------------------------------------------------------------------
# onehot_flag=False : nn.Embedding lookup as a FLOP-free DMA row gather.
# ---------------------------------------------------------------------------
def _embed_gather_kernel(idx_ref, w_hbm, out_ref, row_buf, sem):
    # idx_ref : (M_pad,) int32 in SMEM (scalar prefetch)
    # w_hbm   : (C, E_pad) table in HBM (memory_space=pl.ANY) -- never fully in VMEM
    # out_ref : (bm, E_pad) VMEM output block (lane-dense, E_pad % 128 == 0)
    # row_buf : (bm, E_pad) VMEM gather landing buffer
    # sem     : (1,) DMA semaphore shared by all row copies of this block
    bm = out_ref.shape[0]
    base = pl.program_id(0) * bm
    unroll = bm <= 32

    def _issue(r, carry):
        tok = idx_ref[base + r]
        pltpu.make_async_copy(
            w_hbm.at[pl.ds(tok, 1), :], row_buf.at[pl.ds(r, 1), :], sem.at[0]
        ).start()
        return carry

    jax.lax.fori_loop(0, bm, _issue, 0, unroll=unroll)

    def _drain(r, carry):
        # Waits are cumulative on the shared semaphore: each wait consumes one
        # row's worth of bytes, so bm waits <=> all bm copies have landed.
        pltpu.make_async_copy(
            w_hbm.at[pl.ds(0, 1), :], row_buf.at[pl.ds(0, 1), :], sem.at[0]
        ).wait()
        return carry

    jax.lax.fori_loop(0, bm, _drain, 0, unroll=unroll)

    # One bulk, lane-dense store into the pipelined output block.
    out_ref[...] = row_buf[...]


# ---------------------------------------------------------------------------
# onehot_flag=True : soft labels @ table on the MXU.
# ---------------------------------------------------------------------------
def _embed_matmul_kernel(x_ref, w_ref, out_ref):
    # x_ref: (bm, C) soft labels | w_ref: (C, E_pad) | out_ref: (bm, E_pad)
    # Kept in f32 so arbitrary soft labels match torch.matmul; for a bf16
    # table on v6e/v7x cast BOTH operands to bf16 (never mix MXU dtypes).
    out_ref[...] = jnp.dot(
        x_ref[...], w_ref[...], preferred_element_type=jnp.float32
    ).astype(out_ref.dtype)


def encoder_labels_forward(x, weight, onehot_flag=False):
    """EncoderLabels.forward (inference semantics).

    x      : (B, S) int class ids          (onehot_flag=False)
             (B, S, C) float soft labels   (onehot_flag=True)
    weight : (C, E) embedding table (row C-1 assumed zeroed == padding_idx)
    returns: (B, E, S)  == embeddings.permute(0, 2, 1)
    """
    C, E = weight.shape
    E_pad = _round_up(E, 128)  # lane-dense output stores
    w = weight if E_pad == E else jnp.pad(weight, ((0, 0), (0, E_pad - E)))

    if onehot_flag:
        B, S, _ = x.shape
    else:
        B, S = x.shape
    M = B * S
    bm = _pick_block_m(M)
    nblk = _cdiv(M, bm)
    M_pad = nblk * bm

    compiler_params = pltpu.CompilerParams(
        dimension_semantics=("parallel",),       # shards token blocks across v7x TCs
        vmem_limit_bytes=32 * 1024 * 1024,       # explicit budget; safe on v5e/v6e/v7x
    )

    if onehot_flag:
        x_flat = x.reshape(M, C).astype(w.dtype)
        if M_pad != M:
            x_flat = jnp.pad(x_flat, ((0, M_pad - M), (0, 0)))
        out_flat = pl.pallas_call(
            _embed_matmul_kernel,
            out_shape=jax.ShapeDtypeStruct((M_pad, E_pad), w.dtype),
            grid_spec=pltpu.PrefetchScalarGridSpec(
                num_scalar_prefetch=0,
                grid=(nblk,),
                in_specs=[
                    pl.BlockSpec((bm, C), lambda i: (i, 0)),
                    # Constant index_map -> table DMA'd once, stays VMEM-resident.
                    # TODO(synk): at vocab scale, tile C with an 'arbitrary'
                    # reduction axis instead of holding the full (C, E_pad) tile.
                    pl.BlockSpec((C, E_pad), lambda i: (0, 0)),
                ],
                out_specs=pl.BlockSpec((bm, E_pad), lambda i: (i, 0)),
            ),
            compiler_params=compiler_params,
        )(x_flat, w)
    else:
        idx = x.reshape(M).astype(jnp.int32)
        if M_pad != M:
            # Pad with padding_idx (row C-1, zeroed by contract); padded rows
            # are sliced off below anyway.
            idx = jnp.pad(idx, (0, M_pad - M), constant_values=C - 1)
        out_flat = pl.pallas_call(
            _embed_gather_kernel,
            out_shape=jax.ShapeDtypeStruct((M_pad, E_pad), w.dtype),
            grid_spec=pltpu.PrefetchScalarGridSpec(
                num_scalar_prefetch=1,                          # idx -> SMEM
                grid=(nblk,),
                in_specs=[pl.BlockSpec(memory_space=pl.ANY)],   # table stays in HBM
                out_specs=pl.BlockSpec((bm, E_pad), lambda i, idx_ref: (i, 0)),
                scratch_shapes=[
                    pltpu.VMEM((bm, E_pad), w.dtype),
                    pltpu.SemaphoreType.DMA((1,)),
                ],
            ),
            compiler_params=compiler_params,
        )(idx, w)

    # TODO(synk): training-mode dropout (p=0.5) omitted; eval semantics = identity.
    # Layout plumbing outside the kernel (S << 128 here, so an in-kernel
    # transposed store would be narrow/masked):
    # (M_pad, E_pad) -> (B*S, E) -> (B, S, E) -> (B, E, S) == permute(0, 2, 1).
    out = out_flat[:M, :E]
    return jnp.transpose(out.reshape(B, S, E), (0, 2, 1))


if __name__ == "__main__":
    # Small shapes consistent with the module: batch=2, seq=8,
    # num_classes=16, embed_size=32.
    B, S = 2, 8
    num_classes, embed_size = 16, 32

    key = jax.random.PRNGKey(0)
    k_w, k_idx = jax.random.split(key, 2)

    # Deterministic synthetic embedding table; zero the padding_idx row
    # (num_classes - 1), matching nn.Embedding(padding_idx=...) semantics.
    weight = jax.random.normal(k_w, (num_classes, embed_size), dtype=jnp.float32)
    weight = weight.at[num_classes - 1].set(0.0)

    idx = jax.random.randint(k_idx, (B, S), 0, num_classes, dtype=jnp.int32)

    # --- index-lookup path (onehot_flag=False): DMA row gather ---
    out = jax.block_until_ready(encoder_labels_forward(idx, weight, onehot_flag=False))
    ref = jnp.transpose(weight[idx], (0, 2, 1))          # (B, E, S)
    assert out.shape == (B, embed_size, S)
    assert jnp.allclose(out, ref, atol=1e-5), "lookup path mismatch"

    # --- one-hot / soft-label path (onehot_flag=True): MXU matmul ---
    x_soft = jax.nn.one_hot(idx, num_classes, dtype=jnp.float32)
    out2 = jax.block_until_ready(encoder_labels_forward(x_soft, weight, onehot_flag=True))
    ref2 = jnp.transpose(jnp.einsum("bsc,ce->bse", x_soft, weight), (0, 2, 1))
    assert out2.shape == (B, embed_size, S)
    assert jnp.allclose(out2, ref2, atol=1e-5), "onehot path mismatch"

    print("KERNEL_OK")
</pallas_src>

<mosaic_0001>
module attributes {stable_mosaic.version = 11 : i64} {
  func.func @_embed_gather_kernel(%arg0: i32, %arg1: memref<16xi32, #tpu.memory_space<smem>>, %arg2: memref<16x128xf32, #tpu.memory_space<any>>, %arg3: memref<8x128xf32, #tpu.memory_space<vmem>>, %arg4: memref<8x128xf32, #tpu.memory_space<vmem>>, %arg5: memref<1x!tpu.dma_semaphore, #tpu.memory_space<semaphore_mem>>) attributes {dimension_semantics = [#tpu.dimension_semantics<parallel>], iteration_bounds = array<i64: 2>, scalar_prefetch = 1 : i64, scratch_operands = 2 : i64, tpu.core_type = #tpu.core_type<tc>, window_params = [{}, {transform_indices = @transform_1, window_bounds = array<i64: 8, 128>}]} {
    %c8_i32 = arith.constant 8 : i32
    %0 = arith.muli %arg0, %c8_i32 : i32
    %c0_i32 = arith.constant 0 : i32
    %1 = arith.addi %0, %c0_i32 : i32
    %2 = arith.index_cast %1 : i32 to index
    %3 = memref.load %arg1[%2] : memref<16xi32, #tpu.memory_space<smem>>
    %c0_i32_0 = arith.constant 0 : i32
    %c0_i32_1 = arith.constant 0 : i32
    %4 = tpu.memref_slice %arg2[%3, %c0_i32_1] : memref<16x128xf32, #tpu.memory_space<any>> -> memref<1x128xf32, #tpu.memory_space<any>>
    %c0_i32_2 = arith.constant 0 : i32
    %5 = tpu.memref_slice %arg4[%c0_i32, %c0_i32_2] : memref<8x128xf32, #tpu.memory_space<vmem>> -> memref<1x128xf32, #tpu.memory_space<vmem>>
    %6 = tpu.memref_slice %arg5[%c0_i32_0] : memref<1x!tpu.dma_semaphore, #tpu.memory_space<semaphore_mem>> -> memref<1x!tpu.dma_semaphore, #tpu.memory_space<semaphore_mem>>
    %7 = tpu.memref_squeeze %6 : memref<1x!tpu.dma_semaphore, #tpu.memory_space<semaphore_mem>> -> memref<!tpu.dma_semaphore, #tpu.memory_space<semaphore_mem>>
    tpu.enqueue_dma source(%4 : memref<1x128xf32, #tpu.memory_space<any>>) target(%5 : memref<1x128xf32, #tpu.memory_space<vmem>>) target_semaphore(%7 : memref<!tpu.dma_semaphore, #tpu.memory_space<semaphore_mem>>)
    %c1_i32 = arith.constant 1 : i32
    %8 = arith.addi %0, %c1_i32 : i32
    %9 = arith.index_cast %8 : i32 to index
    %10 = memref.load %arg1[%9] : memref<16xi32, #tpu.memory_space<smem>>
    %c0_i32_3 = arith.constant 0 : i32
    %c0_i32_4 = arith.constant 0 : i32
    %11 = tpu.memref_slice %arg2[%10, %c0_i32_4] : memref<16x128xf32, #tpu.memory_space<any>> -> memref<1x128xf32, #tpu.memory_space<any>>
    %c0_i32_5 = arith.constant 0 : i32
    %12 = tpu.memref_slice %arg4[%c1_i32, %c0_i32_5] : memref<8x128xf32, #tpu.memory_space<vmem>> -> memref<1x128xf32, #tpu.memory_space<vmem>>
    %13 = tpu.memref_slice %arg5[%c0_i32_3] : memref<1x!tpu.dma_semaphore, #tpu.memory_space<semaphore_mem>> -> memref<1x!tpu.dma_semaphore, #tpu.memory_space<semaphore_mem>>
    %14 = tpu.memref_squeeze %13 : memref<1x!tpu.dma_semaphore, #tpu.memory_space<semaphore_mem>> -> memref<!tpu.dma_semaphore, #tpu.memory_space<semaphore_mem>>
    tpu.enqueue_dma source(%11 : memref<1x128xf32, #tpu.memory_space<any>>) target(%12 : memref<1x128xf32, #tpu.memory_space<vmem>>) target_semaphore(%14 : memref<!tpu.dma_semaphore, #tpu.memory_space<semaphore_mem>>)
    %c2_i32 = arith.constant 2 : i32
    %15 = arith.addi %0, %c2_i32 : i32
    %16 = arith.index_cast %15 : i32 to index
    %17 = memref.load %arg1[%16] : memref<16xi32, #tpu.memory_space<smem>>
    %c0_i32_6 = arith.constant 0 : i32
    %c0_i32_7 = arith.constant 0 : i32
    %18 = tpu.memref_slice %arg2[%17, %c0_i32_7] : memref<16x128xf32, #tpu.memory_space<any>> -> memref<1x128xf32, #tpu.memory_space<any>>
    %c0_i32_8 = arith.constant 0 : i32
    %19 = tpu.memref_slice %arg4[%c2_i32, %c0_i32_8] : memref<8x128xf32, #tpu.memory_space<vmem>> -> memref<1x128xf32, #tpu.memory_space<vmem>>
    %20 = tpu.memref_slice %arg5[%c0_i32_6] : memref<1x!tpu.dma_semaphore, #tpu.memory_space<semaphore_mem>> -> memref<1x!tpu.dma_semaphore, #tpu.memory_space<semaphore_mem>>
    %21 = tpu.memref_squeeze %20 : memref<1x!tpu.dma_semaphore, #tpu.memory_space<semaphore_mem>> -> memref<!tpu.dma_semaphore, #tpu.memory_space<semaphore_mem>>
    tpu.enqueue_dma source(%18 : memref<1x128xf32, #tpu.memory_space<any>>) target(%19 : memref<1x128xf32, #tpu.memory_space<vmem>>) target_semaphore(%21 : memref<!tpu.dma_semaphore, #tpu.memory_space<semaphore_mem>>)
    %c3_i32 = arith.constant 3 : i32
    %22 = arith.addi %0, %c3_i32 : i32
    %23 = arith.index_cast %22 : i32 to index
    %24 = memref.load %arg1[%23] : memref<16xi32, #tpu.memory_space<smem>>
    %c0_i32_9 = arith.constant 0 : i32
    %c0_i32_10 = arith.constant 0 : i32
    %25 = tpu.memref_slice %arg2[%24, %c0_i32_10] : memref<16x128xf32, #tpu.memory_space<any>> -> memref<1x128xf32, #tpu.memory_space<any>>
    %c0_i32_11 = arith.constant 0 : i32
    %26 = tpu.memref_slice %arg4[%c3_i32, %c0_i32_11] : memref<8x128xf32, #tpu.memory_space<vmem>> -> memref<1x128xf32, #tpu.memory_space<vmem>>
    %27 = tpu.memref_slice %arg5[%c0_i32_9] : memref<1x!tpu.dma_semaphore, #tpu.memory_space<semaphore_mem>> -> memref<1x!tpu.dma_semaphore, #tpu.memory_space<semaphore_mem>>
    %28 = tpu.memref_squeeze %27 : memref<1x!tpu.dma_semaphore, #tpu.memory_space<semaphore_mem>> -> memref<!tpu.dma_semaphore, #tpu.memory_space<semaphore_mem>>
    tpu.enqueue_dma source(%25 : memref<1x128xf32, #tpu.memory_space<any>>) target(%26 : memref<1x128xf32, #tpu.memory_space<vmem>>) target_semaphore(%28 : memref<!tpu.dma_semaphore, #tpu.memory_space<semaphore_mem>>)
    %c4_i32 = arith.constant 4 : i32
    %29 = arith.addi %0, %c4_i32 : i32
    %30 = arith.index_cast %29 : i32 to index
    %31 = memref.load %arg1[%30] : memref<16xi32, #tpu.memory_space<smem>>
    %c0_i32_12 = arith.constant 0 : i32
    %c0_i32_13 = arith.constant 0 : i32
    %32 = tpu.memref_slice %arg2[%31, %c0_i32_13] : memref<16x128xf32, #tpu.memory_space<any>> -> memref<1x128xf32, #tpu.memory_space<any>>
    %c0_i32_14 = arith.constant 0 : i32
    %33 = tpu.memref_slice %arg4[%c4_i32, %c0_i32_14] : memref<8x128xf32, #tpu.memory_space<vmem>> -> memref<1x128xf32, #tpu.memory_space<vmem>>
    %34 = tpu.memref_slice %arg5[%c0_i32_12] : memref<1x!tpu.dma_semaphore, #tpu.memory_space<semaphore_mem>> -> memref<1x!tpu.dma_semaphore, #tpu.memory_space<semaphore_mem>>
    %35 = tpu.memref_squeeze %34 : memref<1x!tpu.dma_semaphore, #tpu.memory_space<semaphore_mem>> -> memref<!tpu.dma_semaphore, #tpu.memory_space<semaphore_mem>>
    tpu.enqueue_dma source(%32 : memref<1x128xf32, #tpu.memory_space<any>>) target(%33 : memref<1x128xf32, #tpu.memory_space<vmem>>) target_semaphore(%35 : memref<!tpu.dma_semaphore, #tpu.memory_space<semaphore_mem>>)
    %c5_i32 = arith.constant 5 : i32
    %36 = arith.addi %0, %c5_i32 : i32
    %37 = arith.index_cast %36 : i32 to index
    %38 = memref.load %arg1[%37] : memref<16xi32, #tpu.memory_space<smem>>
    %c0_i32_15 = arith.constant 0 : i32
    %c0_i32_16 = arith.constant 0 : i32
    %39 = tpu.memref_slice %arg2[%38, %c0_i32_16] : memref<16x128xf32, #tpu.memory_space<any>> -> memref<1x128xf32, #tpu.memory_space<any>>
    %c0_i32_17 = arith.constant 0 : i32
    %40 = tpu.memref_slice %arg4[%c5_i32, %c0_i32_17] : memref<8x128xf32, #tpu.memory_space<vmem>> -> memref<1x128xf32, #tpu.memory_space<vmem>>
    %41 = tpu.memref_slice %arg5[%c0_i32_15] : memref<1x!tpu.dma_semaphore, #tpu.memory_space<semaphore_mem>> -> memref<1x!tpu.dma_semaphore, #tpu.memory_space<semaphore_mem>>
    %42 = tpu.memref_squeeze %41 : memref<1x!tpu.dma_semaphore, #tpu.memory_space<semaphore_mem>> -> memref<!tpu.dma_semaphore, #tpu.memory_space<semaphore_mem>>
    tpu.enqueue_dma source(%39 : memref<1x128xf32, #tpu.memory_space<any>>) target(%40 : memref<1x128xf32, #tpu.memory_space<vmem>>) target_semaphore(%42 : memref<!tpu.dma_semaphore, #tpu.memory_space<semaphore_mem>>)
    %c6_i32 = arith.constant 6 : i32
    %43 = arith.addi %0, %c6_i32 : i32
    %44 = arith.index_cast %43 : i32 to index
    %45 = memref.load %arg1[%44] : memref<16xi32, #tpu.memory_space<smem>>
    %c0_i32_18 = arith.constant 0 : i32
    %c0_i32_19 = arith.constant 0 : i32
    %46 = tpu.memref_slice %arg2[%45, %c0_i32_19] : memref<16x128xf32, #tpu.memory_space<any>> -> memref<1x128xf32, #tpu.memory_space<any>>
    %c0_i32_20 = arith.constant 0 : i32
    %47 = tpu.memref_slice %arg4[%c6_i32, %c0_i32_20] : memref<8x128xf32, #tpu.memory_space<vmem>> -> memref<1x128xf32, #tpu.memory_space<vmem>>
    %48 = tpu.memref_slice %arg5[%c0_i32_18] : memref<1x!tpu.dma_semaphore, #tpu.memory_space<semaphore_mem>> -> memref<1x!tpu.dma_semaphore, #tpu.memory_space<semaphore_mem>>
    %49 = tpu.memref_squeeze %48 : memref<1x!tpu.dma_semaphore, #tpu.memory_space<semaphore_mem>> -> memref<!tpu.dma_semaphore, #tpu.memory_space<semaphore_mem>>
    tpu.enqueue_dma source(%46 : memref<1x128xf32, #tpu.memory_space<any>>) target(%47 : memref<1x128xf32, #tpu.memory_space<vmem>>) target_semaphore(%49 : memref<!tpu.dma_semaphore, #tpu.memory_space<semaphore_mem>>)
    %c7_i32 = arith.constant 7 : i32
    %50 = arith.addi %0, %c7_i32 : i32
    %51 = arith.index_cast %50 : i32 to index
    %52 = memref.load %arg1[%51] : memref<16xi32, #tpu.memory_space<smem>>
    %c0_i32_21 = arith.constant 0 : i32
    %c0_i32_22 = arith.constant 0 : i32
    %53 = tpu.memref_slice %arg2[%52, %c0_i32_22] : memref<16x128xf32, #tpu.memory_space<any>> -> memref<1x128xf32, #tpu.memory_space<any>>
    %c0_i32_23 = arith.constant 0 : i32
    %54 = tpu.memref_slice %arg4[%c7_i32, %c0_i32_23] : memref<8x128xf32, #tpu.memory_space<vmem>> -> memref<1x128xf32, #tpu.memory_space<vmem>>
    %55 = tpu.memref_slice %arg5[%c0_i32_21] : memref<1x!tpu.dma_semaphore, #tpu.memory_space<semaphore_mem>> -> memref<1x!tpu.dma_semaphore, #tpu.memory_space<semaphore_mem>>
    %56 = tpu.memref_squeeze %55 : memref<1x!tpu.dma_semaphore, #tpu.memory_space<semaphore_mem>> -> memref<!tpu.dma_semaphore, #tpu.memory_space<semaphore_mem>>
    tpu.enqueue_dma source(%53 : memref<1x128xf32, #tpu.memory_space<any>>) target(%54 : memref<1x128xf32, #tpu.memory_space<vmem>>) target_semaphore(%56 : memref<!tpu.dma_semaphore, #tpu.memory_space<semaphore_mem>>)
    %c8_i32_24 = arith.constant 8 : i32
    %c0_i32_25 = arith.constant 0 : i32
    %c0_i32_26 = arith.constant 0 : i32
    %c0_i32_27 = arith.constant 0 : i32
    %c0_i32_28 = arith.constant 0 : i32
    %57 = tpu.memref_slice %arg2[%c0_i32_27, %c0_i32_28] : memref<16x128xf32, #tpu.memory_space<any>> -> memref<1x128xf32, #tpu.memory_space<any>>
    %c0_i32_29 = arith.constant 0 : i32
    %c0_i32_30 = arith.constant 0 : i32
    %58 = tpu.memref_slice %arg4[%c0_i32_29, %c0_i32_30] : memref<8x128xf32, #tpu.memory_space<vmem>> -> memref<1x128xf32, #tpu.memory_space<vmem>>
    %59 = tpu.memref_slice %arg5[%c0_i32_26] : memref<1x!tpu.dma_semaphore, #tpu.memory_space<semaphore_mem>> -> memref<1x!tpu.dma_semaphore, #tpu.memory_space<semaphore_mem>>
    %60 = tpu.memref_squeeze %59 : memref<1x!tpu.dma_semaphore, #tpu.memory_space<semaphore_mem>> -> memref<!tpu.dma_semaphore, #tpu.memory_space<semaphore_mem>>
    tpu.wait_dma2 semaphore(%60 : memref<!tpu.dma_semaphore, #tpu.memory_space<semaphore_mem>>) src(%57 : memref<1x128xf32, #tpu.memory_space<any>>) dst(%58 : memref<1x128xf32, #tpu.memory_space<vmem>>)
    %c1_i32_31 = arith.constant 1 : i32
    %c0_i32_32 = arith.constant 0 : i32
    %c0_i32_33 = arith.constant 0 : i32
    %c0_i32_34 = arith.constant 0 : i32
    %61 = tpu.memref_slice %arg2[%c0_i32_33, %c0_i32_34] : memref<16x128xf32, #tpu.memory_space<any>> -> memref<1x128xf32, #tpu.memory_space<any>>
    %c0_i32_35 = arith.constant 0 : i32
    %c0_i32_36 = arith.constant 0 : i32
    %62 = tpu.memref_slice %arg4[%c0_i32_35, %c0_i32_36] : memref<8x128xf32, #tpu.memory_space<vmem>> -> memref<1x128xf32, #tpu.memory_space<vmem>>
    %63 = tpu.memref_slice %arg5[%c0_i32_32] : memref<1x!tpu.dma_semaphore, #tpu.memory_space<semaphore_mem>> -> memref<1x!tpu.dma_semaphore, #tpu.memory_space<semaphore_mem>>
    %64 = tpu.memref_squeeze %63 : memref<1x!tpu.dma_semaphore, #tpu.memory_space<semaphore_mem>> -> memref<!tpu.dma_semaphore, #tpu.memory_space<semaphore_mem>>
    tpu.wait_dma2 semaphore(%64 : memref<!tpu.dma_semaphore, #tpu.memory_space<semaphore_mem>>) src(%61 : memref<1x128xf32, #tpu.memory_space<any>>) dst(%62 : memref<1x128xf32, #tpu.memory_space<vmem>>)
    %c2_i32_37 = arith.constant 2 : i32
    %c0_i32_38 = arith.constant 0 : i32
    %c0_i32_39 = arith.constant 0 : i32
    %c0_i32_40 = arith.constant 0 : i32
    %65 = tpu.memref_slice %arg2[%c0_i32_39, %c0_i32_40] : memref<16x128xf32, #tpu.memory_space<any>> -> memref<1x128xf32, #tpu.memory_space<any>>
    %c0_i32_41 = arith.constant 0 : i32
    %c0_i32_42 = arith.constant 0 : i32
    %66 = tpu.memref_slice %arg4[%c0_i32_41, %c0_i32_42] : memref<8x128xf32, #tpu.memory_space<vmem>> -> memref<1x128xf32, #tpu.memory_space<vmem>>
    %67 = tpu.memref_slice %arg5[%c0_i32_38] : memref<1x!tpu.dma_semaphore, #tpu.memory_space<semaphore_mem>> -> memref<1x!tpu.dma_semaphore, #tpu.memory_space<semaphore_mem>>
    %68 = tpu.memref_squeeze %67 : memref<1x!tpu.dma_semaphore, #tpu.memory_space<semaphore_mem>> -> memref<!tpu.dma_semaphore, #tpu.memory_space<semaphore_mem>>
    tpu.wait_dma2 semaphore(%68 : memref<!tpu.dma_semaphore, #tpu.memory_space<semaphore_mem>>) src(%65 : memref<1x128xf32, #tpu.memory_space<any>>) dst(%66 : memref<1x128xf32, #tpu.memory_space<vmem>>)
    %c3_i32_43 = arith.constant 3 : i32
    %c0_i32_44 = arith.constant 0 : i32
    %c0_i32_45 = arith.constant 0 : i32
    %c0_i32_46 = arith.constant 0 : i32
    %69 = tpu.memref_slice %arg2[%c0_i32_45, %c0_i32_46] : memref<16x128xf32, #tpu.memory_space<any>> -> memref<1x128xf32, #tpu.memory_space<any>>
    %c0_i32_47 = arith.constant 0 : i32
    %c0_i32_48 = arith.constant 0 : i32
    %70 = tpu.memref_slice %arg4[%c0_i32_47, %c0_i32_48] : memref<8x128xf32, #tpu.memory_space<vmem>> -> memref<1x128xf32, #tpu.memory_space<vmem>>
    %71 = tpu.memref_slice %arg5[%c0_i32_44] : memref<1x!tpu.dma_semaphore, #tpu.memory_space<semaphore_mem>> -> memref<1x!tpu.dma_semaphore, #tpu.memory_space<semaphore_mem>>
    %72 = tpu.memref_squeeze %71 : memref<1x!tpu.dma_semaphore, #tpu.memory_space<semaphore_mem>> -> memref<!tpu.dma_semaphore, #tpu.memory_space<semaphore_mem>>
    tpu.wait_dma2 semaphore(%72 : memref<!tpu.dma_semaphore, #tpu.memory_space<semaphore_mem>>) src(%69 : memref<1x128xf32, #tpu.memory_space<any>>) dst(%70 : memref<1x128xf32, #tpu.memory_space<vmem>>)
    %c4_i32_49 = arith.constant 4 : i32
    %c0_i32_50 = arith.constant 0 : i32
    %c0_i32_51 = arith.constant 0 : i32
    %c0_i32_52 = arith.constant 0 : i32
    %73 = tpu.memref_slice %arg2[%c0_i32_51, %c0_i32_52] : memref<16x128xf32, #tpu.memory_space<any>> -> memref<1x128xf32, #tpu.memory_space<any>>
    %c0_i32_53 = arith.constant 0 : i32
    %c0_i32_54 = arith.constant 0 : i32
    %74 = tpu.memref_slice %arg4[%c0_i32_53, %c0_i32_54] : memref<8x128xf32, #tpu.memory_space<vmem>> -> memref<1x128xf32, #tpu.memory_space<vmem>>
    %75 = tpu.memref_slice %arg5[%c0_i32_50] : memref<1x!tpu.dma_semaphore, #tpu.memory_space<semaphore_mem>> -> memref<1x!tpu.dma_semaphore, #tpu.memory_space<semaphore_mem>>
    %76 = tpu.memref_squeeze %75 : memref<1x!tpu.dma_semaphore, #tpu.memory_space<semaphore_mem>> -> memref<!tpu.dma_semaphore, #tpu.memory_space<semaphore_mem>>
    tpu.wait_dma2 semaphore(%76 : memref<!tpu.dma_semaphore, #tpu.memory_space<semaphore_mem>>) src(%73 : memref<1x128xf32, #tpu.memory_space<any>>) dst(%74 : memref<1x128xf32, #tpu.memory_space<vmem>>)
    %c5_i32_55 = arith.constant 5 : i32
    %c0_i32_56 = arith.constant 0 : i32
    %c0_i32_57 = arith.constant 0 : i32
    %c0_i32_58 = arith.constant 0 : i32
    %77 = tpu.memref_slice %arg2[%c0_i32_57, %c0_i32_58] : memref<16x128xf32, #tpu.memory_space<any>> -> memref<1x128xf32, #tpu.memory_space<any>>
    %c0_i32_59 = arith.constant 0 : i32
    %c0_i32_60 = arith.constant 0 : i32
    %78 = tpu.memref_slice %arg4[%c0_i32_59, %c0_i32_60] : memref<8x128xf32, #tpu.memory_space<vmem>> -> memref<1x128xf32, #tpu.memory_space<vmem>>
    %79 = tpu.memref_slice %arg5[%c0_i32_56] : memref<1x!tpu.dma_semaphore, #tpu.memory_space<semaphore_mem>> -> memref<1x!tpu.dma_semaphore, #tpu.memory_space<semaphore_mem>>
    %80 = tpu.memref_squeeze %79 : memref<1x!tpu.dma_semaphore, #tpu.memory_space<semaphore_mem>> -> memref<!tpu.dma_semaphore, #tpu.memory_space<semaphore_mem>>
    tpu.wait_dma2 semaphore(%80 : memref<!tpu.dma_semaphore, #tpu.memory_space<semaphore_mem>>) src(%77 : memref<1x128xf32, #tpu.memory_space<any>>) dst(%78 : memref<1x128xf32, #tpu.memory_space<vmem>>)
    %c6_i32_61 = arith.constant 6 : i32
    %c0_i32_62 = arith.constant 0 : i32
    %c0_i32_63 = arith.constant 0 : i32
    %c0_i32_64 = arith.constant 0 : i32
    %81 = tpu.memref_slice %arg2[%c0_i32_63, %c0_i32_64] : memref<16x128xf32, #tpu.memory_space<any>> -> memref<1x128xf32, #tpu.memory_space<any>>
    %c0_i32_65 = arith.constant 0 : i32
    %c0_i32_66 = arith.constant 0 : i32
    %82 = tpu.memref_slice %arg4[%c0_i32_65, %c0_i32_66] : memref<8x128xf32, #tpu.memory_space<vmem>> -> memref<1x128xf32, #tpu.memory_space<vmem>>
    %83 = tpu.memref_slice %arg5[%c0_i32_62] : memref<1x!tpu.dma_semaphore, #tpu.memory_space<semaphore_mem>> -> memref<1x!tpu.dma_semaphore, #tpu.memory_space<semaphore_mem>>
    %84 = tpu.memref_squeeze %83 : memref<1x!tpu.dma_semaphore, #tpu.memory_space<semaphore_mem>> -> memref<!tpu.dma_semaphore, #tpu.memory_space<semaphore_mem>>
    tpu.wait_dma2 semaphore(%84 : memref<!tpu.dma_semaphore, #tpu.memory_space<semaphore_mem>>) src(%81 : memref<1x128xf32, #tpu.memory_space<any>>) dst(%82 : memref<1x128xf32, #tpu.memory_space<vmem>>)
    %c7_i32_67 = arith.constant 7 : i32
    %c0_i32_68 = arith.constant 0 : i32
    %c0_i32_69 = arith.constant 0 : i32
    %c0_i32_70 = arith.constant 0 : i32
    %85 = tpu.memref_slice %arg2[%c0_i32_69, %c0_i32_70] : memref<16x128xf32, #tpu.memory_space<any>> -> memref<1x128xf32, #tpu.memory_space<any>>
    %c0_i32_71 = arith.constant 0 : i32
    %c0_i32_72 = arith.constant 0 : i32
    %86 = tpu.memref_slice %arg4[%c0_i32_71, %c0_i32_72] : memref<8x128xf32, #tpu.memory_space<vmem>> -> memref<1x128xf32, #tpu.memory_space<vmem>>
    %87 = tpu.memref_slice %arg5[%c0_i32_68] : memref<1x!tpu.dma_semaphore, #tpu.memory_space<semaphore_mem>> -> memref<1x!tpu.dma_semaphore, #tpu.memory_space<semaphore_mem>>
    %88 = tpu.memref_squeeze %87 : memref<1x!tpu.dma_semaphore, #tpu.memory_space<semaphore_mem>> -> memref<!tpu.dma_semaphore, #tpu.memory_space<semaphore_mem>>
    tpu.wait_dma2 semaphore(%88 : memref<!tpu.dma_semaphore, #tpu.memory_space<semaphore_mem>>) src(%85 : memref<1x128xf32, #tpu.memory_space<any>>) dst(%86 : memref<1x128xf32, #tpu.memory_space<vmem>>)
    %c0 = arith.constant 0 : index
    %c0_73 = arith.constant 0 : index
    %89 = vector.load %arg4[%c0, %c0_73] : memref<8x128xf32, #tpu.memory_space<vmem>>, vector<8x128xf32>
    %c0_74 = arith.constant 0 : index
    %c0_75 = arith.constant 0 : index
    %90 = vector.load %arg3[%c0_74, %c0_75] : memref<8x128xf32, #tpu.memory_space<vmem>>, vector<8x128xf32>
    tpu.vector_store %arg3[%c0_74, %c0_75], %89 {strides = array<i32>} : memref<8x128xf32, #tpu.memory_space<vmem>>, vector<8x128xf32>,
    return
  }
  func.func @transform_1(%arg0: i32, %arg1: memref<16xi32, #tpu.memory_space<smem>>) -> (i32, i32) {
    %c0_i32 = arith.constant 0 : i32
    %c0_i32_0 = arith.constant 0 : i32
    return %arg0, %c0_i32 : i32, i32
  }
}

</mosaic_0001>

<bundles_post_ra>
// kernel: tpu_custom_call.1
= control target key start
LH: loop header
LB: loop body
LE: loop exit
PB: predicated region body
PF: predicated region fallthrough
CT: control target
= control target key end

     0   :  { %s577_s9 = smov [#allocation5]   ;;  %s810_s0 = inlined_call_operand.hbm [shape: s32[16], index: 0, kind: input, shape index: {}]   ;;  %s811_s1 = inlined_call_operand.hbm [shape: f32[16,128], index: 1, kind: input, shape index: {}]   ;;  %s812_s2 = inlined_call_operand.hbm [shape: f32[16,128], index: 2, kind: output, shape index: {}]  }
   0x1   :  { %8 = dma.hbm_to_smem %s810_s0, 16, %s577_s9, [#allocation4] }
   0x2   :  { %557 = dma.done.wait [#allocation4], 16 }
   0x3   :  { %558 = vsyncadd [#allocation4], 4294967280 }
   0x4   :  { %10 = sfence }
   0x5   :  { %11 = vsyncpa [#allocation7], 0 }
   0x6   :  { %13 = vsyncpa [#allocation7 + $0x1], 0  ;;  %s605_s12 = smov 0   ;;  %s607_s13 = smov 0  }
   0x7   :  { %s609_s14 = smov 0  }
   0x8 LB: > { %s277_s0 = sadd.s32 4294967295, %s575_s14   ;;  %s622_s15 = sadd.s32 1, %s575_s14   ;;  %s575_s14 = sphi %s609_s14, %s817_s14   ;;  %s571_s13 = sphi %s607_s13, %s816_s13   ;;  %s567_s12 = sphi %s605_s12, %s815_s12  }
   0x9   : > { %s22_s16 = ssub.s32 %s575_s14, %s622_s15  ;;  %s25_s17 = sadd.s32 1, %s571_s13 }
   0xa   : > { %p23_p0 = scmp.eq.s32.totalorder %s22_s16, 0  ;;  %p278_p1 = scmp.ne.s32.totalorder %s22_s16, 0 }
   0xb   : > { %p29_p2 = scmp.eq.s32.totalorder %s575_s14, 1  ;;  %p34_p3 = scmp.ne.s32.totalorder %s571_s13, %s567_s12 }
   0xc   : > { %s631_s18 = scalar_select %p23_p0, %s571_s13, %s25_s17  }
   0xd   : > { %p633_p4 = por %p278_p1, %p29_p2  ;;  %p35_p5 = scmp.eq.s32.totalorder %s277_s0, 1 }
   0xe   : > { %p279_p7 = scmp.ge.s32.totalorder %s575_s14, 2 }
   0xf   : > { %p637_p6 = por %p35_p5, %p34_p3  ;;  %s49_s21 = sand.u32 (!%p279_p7), 1, %s571_s13  }
  0x10   : > { %44 = sbr.rel (%p279_p7) target bundleno = 206 (0xce), region = 12  ;;  %s644_s22 = sshll.u32 (!%p279_p7), %s575_s14, 3 }
  0x11   : > { %s648_s23 = sshll.u32 (!%p279_p7), %s49_s21, 3  ;;  %s53_s24 = sld [smem:[#allocation5 + %s644_s22]] (!%p279_p7) }
  0x12   : > { %s578_s25 = smov (!%p279_p7), [#allocation2]   ;;  %s67_s27 = sadd.s32 (!%p279_p7), 1, %s644_s22 }
  0x13   : > { %s63_s26 = sshll.u32 (!%p279_p7), %s578_s25, 4  ;;  %s654_s28 = sld [smem:[#allocation5 + %s67_s27]] (!%p279_p7)  ;;  %s652_s26 = int_to_ptr.vmem [resolvable:$true] %s63_s26 }
  0x14   : > { %s83_s29 = sadd.s32 (!%p279_p7), 2, %s644_s22  ;;  %s579_s30 = smov (!%p279_p7), [#allocation2 + $0x1]  }
  0x15   : > { %s79_s3 = sshll.u32 %s579_s30, 4  ;;  %s657_s4 = sld [smem:[#allocation5 + %s83_s29]]  ;;  %s659_s3 = int_to_ptr.vmem [resolvable:$true] %s79_s3 }
  0x16   : > { %s667_s0 = scalar_lea.hbm %s811_s1, 256 }
  0x17   : > { %s282_s5 = sshll.u32 %s53_s24, 4 }
  0x18   : > { %s55_s8 = scalar_lea.hbm %s811_s1, %s282_s5 }
  0x19   : > { %s343_s9 = scalar_lea.hbm %s55_s8, 16  ;;  %p346_p9 = scmp.lt.s32.totalorder %s55_s8, %s811_s1 }
  0x1a   : > { %p344_p8 = scmp.ne.s32.totalorder %s55_s8, %s343_s9  ;;  %p347_p10 = scmp.lt.s32.totalorder %s667_s0, %s343_s9 }
  0x1c   : > { %p348_p11 = por %p347_p10, %p346_p9 }
  0x1e   : > { %p349_p12 = pnand %p348_p11, %p344_p8 }
  0x20   : > { %352 = shalt.err (!%p349_p12)  }
  0x21   : > { %s353_s24 = scalar_lea.vmem %s652_s26, 16  ;;  %s676_s25 = scalar_lea.vmem %s652_s26, 128 }
  0x22   : > { %p354_p13 = scmp.ne.s32.totalorder %s652_s26, %s353_s24  ;;  %p358_p0 = scmp.lt.s32.totalorder %s652_s26, %s652_s26 }
  0x23   : > { %p359_p1 = scmp.lt.s32.totalorder %s676_s25, %s353_s24 }
  0x25   : > { %p360_p2 = por %p359_p1, %p358_p0 }
  0x27   : > { %p361_p3 = pnand %p360_p2, %p354_p13 }
  0x29   : > { %364 = shalt.err (!%p361_p3)  }
  0x2a   : > { %66 = dma.hbm_to_vmem [thread:$0]  %s55_s8, 16, %s652_s26, [#allocation3] }
  0x2b   : > { %s283_s27 = sshll.u32 %s654_s28, 4  ;;  %s580_s29 = smov [#allocation2 + $0x2]  }
  0x2c   : > { %s95_s30 = sshll.u32 %s580_s29, 4  ;;  %s70_s7 = scalar_lea.hbm %s811_s1, %s283_s27  ;;  %s686_s30 = int_to_ptr.vmem [resolvable:$true] %s95_s30 }
  0x2d   : > { %s365_s9 = scalar_lea.hbm %s70_s7, 16  ;;  %p368_p7 = scmp.lt.s32.totalorder %s70_s7, %s811_s1 }
  0x2e   : > { %p366_p5 = scmp.ne.s32.totalorder %s70_s7, %s365_s9  ;;  %p369_p8 = scmp.lt.s32.totalorder %s667_s0, %s365_s9 }
  0x30   : > { %p370_p9 = por %p369_p8, %p368_p7 }
  0x32   : > { %p371_p10 = pnand %p370_p9, %p366_p5 }
  0x34   : > { %374 = shalt.err (!%p371_p10)  }
  0x35   : > { %s375_s28 = scalar_lea.vmem %s659_s3, 16  ;;  %p380_p12 = scmp.lt.s32.totalorder %s659_s3, %s652_s26 }
  0x36   : > { %p376_p11 = scmp.ne.s32.totalorder %s659_s3, %s375_s28  ;;  %p381_p13 = scmp.lt.s32.totalorder %s676_s25, %s375_s28 }
  0x38   : > { %p382_p0 = por %p381_p13, %p380_p12 }
  0x3a   : > { %p383_p1 = pnand %p382_p0, %p376_p11 }
  0x3c   : > { %386 = shalt.err (!%p383_p1)  }
  0x3d   : > { %82 = dma.hbm_to_vmem [thread:$0]  %s70_s7, 16, %s659_s3, [#allocation3] }
  0x3e   : > { %s284_s8 = sshll.u32 %s657_s4, 4  ;;  %s99_s16 = sadd.s32 3, %s644_s22 }
  0x3f   : > { %s86_s27 = scalar_lea.hbm %s811_s1, %s284_s8  ;;  %s100_s29 = sld [smem:[#allocation5 + %s99_s16]] }
  0x40   : > { %s387_s5 = scalar_lea.hbm %s86_s27, 16  ;;  %p390_p3 = scmp.lt.s32.totalorder %s86_s27, %s811_s1 }
  0x41   : > { %p388_p2 = scmp.ne.s32.totalorder %s86_s27, %s387_s5  ;;  %p391_p5 = scmp.lt.s32.totalorder %s667_s0, %s387_s5 }
  0x43   : > { %p392_p7 = por %p391_p5, %p390_p3 }
  0x45   : > { %p393_p8 = pnand %p392_p7, %p388_p2 }
  0x47   : > { %396 = shalt.err (!%p393_p8)  }
  0x48   : > { %s397_s3 = scalar_lea.vmem %s686_s30, 16  ;;  %p402_p10 = scmp.lt.s32.totalorder %s686_s30, %s652_s26 }
  0x49   : > { %p398_p9 = scmp.ne.s32.totalorder %s686_s30, %s397_s3  ;;  %p403_p11 = scmp.lt.s32.totalorder %s676_s25, %s397_s3 }
  0x4b   : > { %p404_p12 = por %p403_p11, %p402_p10 }
  0x4d   : > { %p405_p13 = pnand %p404_p12, %p398_p9 }
  0x4f   : > { %408 = shalt.err (!%p405_p13)  }
  0x50   : > { %98 = dma.hbm_to_vmem [thread:$0]  %s86_s27, 16, %s686_s30, [#allocation3] }
  0x51   : > { %s115_s4 = sadd.s32 4, %s644_s22  ;;  %s581_s7 = smov [#allocation2 + $0x3]  }
  0x52   : > { %s111_s10 = sshll.u32 %s581_s7, 4  ;;  %s116_s11 = sld [smem:[#allocation5 + %s115_s4]]  ;;  %s112_s10 = int_to_ptr.vmem [resolvable:$true] %s111_s10 }
  0x53   : > { %s582_s28 = smov [#allocation2 + $0x4]   ;;  %s131_s16 = sadd.s32 5, %s644_s22 }
  0x54   : > { %s127_s8 = sshll.u32 %s582_s28, 4  ;;  %s285_s17 = sshll.u32 %s100_s29, 4  ;;  %s715_s8 = int_to_ptr.vmem [resolvable:$true] %s127_s8 }
  0x55   : > { %s102_s6 = scalar_lea.hbm %s811_s1, %s285_s17  ;;  %s720_s9 = sld [smem:[#allocation5 + %s131_s16]] }
  0x56   : > { %s409_s3 = scalar_lea.hbm %s102_s6, 16  ;;  %p412_p1 = scmp.lt.s32.totalorder %s102_s6, %s811_s1 }
  0x57   : > { %p410_p0 = scmp.ne.s32.totalorder %s102_s6, %s409_s3  ;;  %p413_p2 = scmp.lt.s32.totalorder %s667_s0, %s409_s3 }
  0x59   : > { %p414_p3 = por %p413_p2, %p412_p1 }
  0x5b   : > { %p415_p5 = pnand %p414_p3, %p410_p0 }
  0x5d   : > { %418 = shalt.err (!%p415_p5)  }
  0x5e   : > { %s419_s4 = scalar_lea.vmem %s112_s10, 16  ;;  %p424_p8 = scmp.lt.s32.totalorder %s112_s10, %s652_s26 }
  0x5f   : > { %p420_p7 = scmp.ne.s32.totalorder %s112_s10, %s419_s4  ;;  %p425_p9 = scmp.lt.s32.totalorder %s676_s25, %s419_s4 }
  0x61   : > { %p426_p10 = por %p425_p9, %p424_p8 }
  0x63   : > { %p427_p11 = pnand %p426_p10, %p420_p7 }
  0x65   : > { %430 = shalt.err (!%p427_p11)  }
  0x66   : > { %114 = dma.hbm_to_vmem [thread:$0]  %s102_s6, 16, %s112_s10, [#allocation3] }
  0x67   : > { %s286_s29 = sshll.u32 %s116_s11, 4  ;;  %s583_s17 = smov [#allocation2 + $0x5]  }
  0x68   : > { %s118_s16 = scalar_lea.hbm %s811_s1, %s286_s29  ;;  %s143_s24 = sshll.u32 %s583_s17, 4  ;;  %s144_s24 = int_to_ptr.vmem [resolvable:$true] %s143_s24 }
  0x69   : > { %s431_s5 = scalar_lea.hbm %s118_s16, 16  ;;  %p434_p13 = scmp.lt.s32.totalorder %s118_s16, %s811_s1 }
  0x6a   : > { %p432_p12 = scmp.ne.s32.totalorder %s118_s16, %s431_s5  ;;  %p435_p0 = scmp.lt.s32.totalorder %s667_s0, %s431_s5 }
  0x6c   : > { %p436_p1 = por %p435_p0, %p434_p13 }
  0x6e   : > { %p437_p2 = pnand %p436_p1, %p432_p12 }
  0x70   : > { %440 = shalt.err (!%p437_p2)  }
  0x71   : > { %s441_s10 = scalar_lea.vmem %s715_s8, 16  ;;  %p446_p5 = scmp.lt.s32.totalorder %s715_s8, %s652_s26 }
  0x72   : > { %p442_p3 = scmp.ne.s32.totalorder %s715_s8, %s441_s10  ;;  %p447_p7 = scmp.lt.s32.totalorder %s676_s25, %s441_s10 }
  0x74   : > { %p448_p8 = por %p447_p7, %p446_p5 }
  0x76   : > { %p449_p9 = pnand %p448_p8, %p442_p3 }
  0x78   : > { %452 = shalt.err (!%p449_p9)  }
  0x79   : > { %130 = dma.hbm_to_vmem [thread:$0]  %s118_s16, 16, %s715_s8, [#allocation3] }
  0x7a   : > { %s147_s11 = sadd.s32 6, %s644_s22  ;;  %s287_s6 = sshll.u32 %s720_s9, 4 }
  0x7b   : > { %s148_s27 = sld [smem:[#allocation5 + %s147_s11]]  ;;  %s134_s7 = scalar_lea.hbm %s811_s1, %s287_s6 }
  0x7c   : > { %s453_s28 = scalar_lea.hbm %s134_s7, 16  ;;  %p456_p11 = scmp.lt.s32.totalorder %s134_s7, %s811_s1 }
  0x7d   : > { %p454_p10 = scmp.ne.s32.totalorder %s134_s7, %s453_s28  ;;  %p457_p12 = scmp.lt.s32.totalorder %s667_s0, %s453_s28 }
  0x7f   : > { %p458_p13 = por %p457_p12, %p456_p11 }
  0x81   : > { %p459_p0 = pnand %p458_p13, %p454_p10 }
  0x83   : > { %462 = shalt.err (!%p459_p0)  }
  0x84   : > { %s463_s3 = scalar_lea.vmem %s144_s24, 16  ;;  %p468_p2 = scmp.lt.s32.totalorder %s144_s24, %s652_s26 }
  0x85   : > { %p464_p1 = scmp.ne.s32.totalorder %s144_s24, %s463_s3  ;;  %p469_p3 = scmp.lt.s32.totalorder %s676_s25, %s463_s3 }
  0x87   : > { %p470_p5 = por %p469_p3, %p468_p2 }
  0x89   : > { %p471_p7 = pnand %p470_p5, %p464_p1 }
  0x8b   : > { %474 = shalt.err (!%p471_p7)  }
  0x8c   : > { %146 = dma.hbm_to_vmem [thread:$0]  %s134_s7, 16, %s144_s24, [#allocation3] }
  0x8d   : > { %s584_s8 = smov [#allocation2 + $0x6]   ;;  %s163_s16 = sadd.s32 7, %s644_s22 }
  0x8e   : > { %s159_s9 = sshll.u32 %s584_s8, 4  ;;  %s164_s30 = sld [smem:[#allocation5 + %s163_s16]]  ;;  %s160_s9 = int_to_ptr.vmem [resolvable:$true] %s159_s9 }
  0x8f   : > { %s288_s10 = sshll.u32 %s148_s27, 4  ;;  %s585_s11 = smov [#allocation2 + $0x7]  }
  0x90   : > { %s175_s6 = sshll.u32 %s585_s11, 4  ;;  %s150_s28 = scalar_lea.hbm %s811_s1, %s288_s10  ;;  %s176_s6 = int_to_ptr.vmem [resolvable:$true] %s175_s6 }
  0x91   : > { %s475_s17 = scalar_lea.hbm %s150_s28, 16  ;;  %p478_p9 = scmp.lt.s32.totalorder %s150_s28, %s811_s1 }
  0x92   : > { %p476_p8 = scmp.ne.s32.totalorder %s150_s28, %s475_s17  ;;  %p479_p10 = scmp.lt.s32.totalorder %s667_s0, %s475_s17 }
  0x94   : > { %p480_p11 = por %p479_p10, %p478_p9 }
  0x96   : > { %p481_p12 = pnand %p480_p11, %p476_p8 }
  0x98   : > { %484 = shalt.err (!%p481_p12)  }
  0x99   : > { %s485_s22 = scalar_lea.vmem %s160_s9, 16  ;;  %p490_p0 = scmp.lt.s32.totalorder %s160_s9, %s652_s26 }
  0x9a   : > { %p486_p13 = scmp.ne.s32.totalorder %s160_s9, %s485_s22  ;;  %p491_p1 = scmp.lt.s32.totalorder %s676_s25, %s485_s22 }
  0x9c   : > { %p492_p2 = por %p491_p1, %p490_p0 }
  0x9e   : > { %p493_p3 = pnand %p492_p2, %p486_p13 }
  0xa0   : > { %496 = shalt.err (!%p493_p3)  }
  0xa1   : > { %162 = dma.hbm_to_vmem [thread:$0]  %s150_s28, 16, %s160_s9, [#allocation3] }
  0xa2   : > { %s289_s24 = sshll.u32 %s164_s30, 4 }
  0xa3   : > { %s166_s8 = scalar_lea.hbm %s811_s1, %s289_s24 }
  0xa4   : > { %s497_s16 = scalar_lea.hbm %s166_s8, 16  ;;  %p500_p7 = scmp.lt.s32.totalorder %s166_s8, %s811_s1 }
  0xa5   : > { %p498_p5 = scmp.ne.s32.totalorder %s166_s8, %s497_s16  ;;  %p501_p8 = scmp.lt.s32.totalorder %s667_s0, %s497_s16 }
  0xa7   : > { %p502_p9 = por %p501_p8, %p500_p7 }
  0xa9   : > { %p503_p10 = pnand %p502_p9, %p498_p5 }
  0xab   : > { %506 = shalt.err (!%p503_p10)  }
  0xac   : > { %s507_s4 = scalar_lea.vmem %s176_s6, 16  ;;  %p512_p12 = scmp.lt.s32.totalorder %s176_s6, %s652_s26 }
  0xad   : > { %p508_p11 = scmp.ne.s32.totalorder %s176_s6, %s507_s4  ;;  %p513_p13 = scmp.lt.s32.totalorder %s676_s25, %s507_s4 }
  0xaf   : > { %p514_p0 = por %p513_p13, %p512_p12 }
  0xb1   : > { %p515_p1 = pnand %p514_p0, %p508_p11 }
  0xb3   : > { %518 = shalt.err (!%p515_p1)  }
  0xb4   : > { %178 = dma.hbm_to_vmem [thread:$0]  %s166_s8, 16, %s176_s6, [#allocation3] }
  0xb5   : > { %s51_s9 = scalar_lea.vmem [#allocation6], %s648_s23 }
  0xb6   : > { %559 = dma.done.wait [#allocation3], 128 }
  0xb7   : > { %560 = vsyncadd [#allocation3], 4294967168  ;;  %s291_s0 = sshll.u32 %s575_s14, 7  ;;  %s212_s30 = sshll.u32 %s51_s9, 4  ;;  %v196_v0 = vld [vmem:[#allocation2] sm:$0xff]  ;;  %s213_s30 = int_to_ptr.vmem [resolvable:$true] %s212_s30 }
  0xb8   : > { %s776_s17 = scalar_lea.hbm %s812_s2, %s291_s0  ;;  %197 = vst [vmem:[%s51_s9] sm:$0xff] %v196_v0  ;;  %s199_s26 = scalar_lea.sflag [#allocation7], %s49_s21 }
  0xb9   : > { %s519_s25 = scalar_lea.vmem %s213_s30, 128  ;;  %s586_s23 = smov [#allocation6]  }
  0xba   : > { %p520_p2 = scmp.ne.s32.totalorder %s213_s30, %s519_s25  ;;  %s523_s6 = sshll.u32 %s586_s23, 4  ;;  %s524_s6 = int_to_ptr.vmem [resolvable:$false] %s523_s6 }
  0xbb   : > { %s525_s5 = scalar_lea.vmem %s524_s6, 256  ;;  %p526_p7 = scmp.lt.s32.totalorder %s213_s30, %s524_s6 }
  0xbc   : > { %p521_p3 = pnand %p520_p2, %p633_p4  ;;  %p527_p8 = scmp.lt.s32.totalorder %s525_s5, %s519_s25 }
  0xbe   : > { %p522_p5 = pneg %p521_p3  ;;  %p528_p9 = por %p527_p8, %p526_p7 }
  0xc0   : > { %p529_p10 = pnand %p528_p9, %p522_p5 }
  0xc2   : > { %532 = shalt.err (!%p529_p10)
}
  0xc3   : > { %s533_s3 = scalar_lea.hbm %s776_s17, 128  ;;  %s537_s24 = scalar_lea.hbm %s812_s2, 256 }
  0xc4   : > { %p534_p11 = scmp.ne.s32.totalorder %s776_s17, %s533_s3  ;;  %p538_p0 = scmp.lt.s32.totalorder %s776_s17, %s812_s2 }
  0xc5   : > { %p539_p1 = scmp.lt.s32.totalorder %s537_s24, %s533_s3 }
  0xc6   : > { %p535_p12 = pnand %p534_p11, %p633_p4 }
  0xc7   : > { %p540_p2 = por %p539_p1, %p538_p0 }
  0xc8   : > { %p536_p13 = pneg %p535_p12 }
  0xca   : > { %p541_p3 = pnand %p540_p2, %p536_p13 }
  0xcc   : > { %544 = shalt.err (!%p541_p3)
}
  0xcd   : > { %295 = dma.vmem_to_hbm [thread:$0]  (%p633_p4), %s213_s30, 128, %s776_s17, %s199_s26  }
  0xce PF: > { %p301_p5 = scmp.ge.s32.totalorder %s575_s14, 1  ;;  %s224_s8 = sand.u32 1, %s567_s12  }
  0xcf   : > { %s225_s16 = scalar_lea.sflag [#allocation7], %s224_s8 }
  0xd0   : > { %p298_p7 = pnand %p301_p5, %p637_p6 }
  0xd2   : > { %p299_p8 = pneg %p298_p7 }
  0xd4   : > { %562 = dma.done.wait (%p299_p8), %s225_s16, 128  }
  0xd5   : > { %564 = vsyncadd (%p299_p8), %s225_s16, 4294967168  ;;  %p16_p9 = scmp.ge.s32.totalorder %s622_s15, 3   ;;  %s815_s12 = smov %s571_s13 }
  0xd6   : > { %s816_s13 = smov %s631_s18  ;;  %s817_s14 = smov %s622_s15 }
  0xd7   :  { %18 = sbr.rel (!%p16_p9) target bundleno = 8 (0x8), region = 91 }
  0xdc   :  { %230 = vsyncpa [#allocation7], 1 }
  0xdd   :  { %232 = vsyncpa [#allocation7 + $0x1], 1 }
  0xde   :  { %233 = vsyncmov [#allocation3] }
  0xe1   :  { %s234_s14 = vpop.sfrf %233 }
  0xe2   :  { %p294_p4 = scmp.ne.s32.totalorder %s234_s14, 0 }
  0xe4   :  { %238 = shalt.err (%p294_p4)  }

</bundles_post_ra>
